<compile_context>
chip_gen: v7x
topology: tpu7x:2x2x1
jax: 0.10.0
libtpu: 0.0.40
codegen_flags: <defaults>
</compile_context>

<pallas_src>
import math

import jax
import jax.numpy as jnp
from jax import lax
from jax.experimental import pallas as pl
from jax.experimental.pallas import tpu as pltpu


# ---------------------------------------------------------------------------
# Kernel bodies
# ---------------------------------------------------------------------------

def _onehot_gather_kernel(idx_ref, tbl_hbm, out_ref, tbl_vmem, iota_vmem, sem):
    """Small-vocabulary path: gather expressed as (one-hot @ table) on the MXU.

    idx_ref:   (TB, 1) int32  VMEM block of token indices for this grid step.
    tbl_hbm:   (V, E)         full table, left in HBM (memory_space=pl.ANY).
    out_ref:   (TB, E)        output block.
    tbl_vmem:  (V, E)         scratch; table copied here ONCE (single-buffered).
    iota_vmem: (TB, V) int32  scratch; grid-invariant column iota, built ONCE.
    sem:                      DMA semaphore for the one-time table copy.
    """
    @pl.when(pl.program_id(0) == 0)
    def _init():
        # One-time, single-buffered HBM->VMEM copy of the whole table.
        cp = pltpu.make_async_copy(tbl_hbm, tbl_vmem, sem)
        cp.start()
        cp.wait()
        # Grid-invariant iota hoisted out of the per-step one-hot build
        # (removes ~1/3 of the VALU work per step).
        iota_vmem[...] = lax.broadcasted_iota(jnp.int32, iota_vmem.shape, 1)

    idx = idx_ref[...]                                           # (TB, 1)
    # 0/1 selection matrix in the table's dtype: exact, and bf16 tables avoid
    # the multi-pass f32xf32 MXU path.
    onehot = (iota_vmem[...] == idx).astype(tbl_vmem.dtype)      # (TB, V)
    out_ref[...] = jnp.dot(
        onehot, tbl_vmem[...], preferred_element_type=jnp.float32
    ).astype(out_ref.dtype)


def _rowcopy_gather_kernel(idx_smem, tbl_hbm, out_ref, tbl_vmem, sem):
    """Larger-vocabulary path: O(TB*E) dynamic row copies, no one-hot, no MXU.

    idx_smem: (padded,) int32 scalar-prefetched token indices in SMEM.
    tbl_hbm:  (V, E)  full table in HBM (memory_space=pl.ANY).
    out_ref:  (TB, E) output block.
    tbl_vmem: (V, E)  VMEM-resident table scratch (copied once).
    """
    i = pl.program_id(0)

    @pl.when(i == 0)
    def _init():
        cp = pltpu.make_async_copy(tbl_hbm, tbl_vmem, sem)
        cp.start()
        cp.wait()

    tb = out_ref.shape[0]
    base = i * tb

    def body(t, carry):
        row = idx_smem[base + t]
        out_ref[pl.ds(t, 1), :] = tbl_vmem[pl.ds(row, 1), :]
        return carry

    lax.fori_loop(0, tb, body, 0)


# ---------------------------------------------------------------------------
# Wrapper
# ---------------------------------------------------------------------------

def _pad_up(x, m):
    return ((x + m - 1) // m) * m


def _vmem_budget_bytes():
    """Generation-aware per-TensorCore VMEM budget."""
    try:
        cap = int(pltpu.get_tpu_info().vmem_capacity_bytes)
    except Exception:
        cap = 64 << 20                      # conservative: v7x per-core VMEM
    return (cap * 3) // 4                   # ~96 MiB on v5e/v6e, ~48 MiB on v7x


def expandable_embedding_forward(indices, table, *, block_tokens=512):
    """Pallas embedding gather: returns table[indices] with trailing dim E."""
    orig_shape = indices.shape
    v, e = table.shape
    dtype = table.dtype
    itemsize = jnp.dtype(dtype).itemsize

    flat = indices.reshape(-1).astype(jnp.int32)
    n = flat.shape[0]
    if n == 0:
        return jnp.zeros(orig_shape + (e,), dtype=dtype)

    # OOB safety: clamp (PyTorch nn.Embedding would raise instead).
    flat = jnp.clip(flat, 0, v - 1)

    # ---- static path selection --------------------------------------------
    # The one-hot matmul does O(V) redundant MACs per token plus a VALU-heavy
    # one-hot build, so it is only used while V is small; narrow E makes the
    # VALU (not the MXU) the binding unit, so its V-crossover is smaller.
    use_onehot = (v <= 128) or (v <= 1024 and e >= 48)

    budget = _vmem_budget_bytes()

    # ---- token block size (never shrunk for large vocabularies) -----------
    tb = int(block_tokens)
    n8 = _pad_up(n, 8)
    if n8 < tb:
        tb = n8                              # whole-sublane blocks
    padded = _pad_up(n, tb)

    # ---- per-TensorCore VMEM estimate (counts padding of every buffer) ----
    vp = _pad_up(v, 8)
    ep = _pad_up(e, 128)
    vl = _pad_up(v, 128)
    tbl_bytes = vp * ep * itemsize                    # resident table (x1)
    out_bytes = 2 * tb * ep * itemsize                # double-buffered output
    if use_onehot:
        idx_bytes = 2 * tb * 128 * 4                  # (TB,1) idx pads to 128 lanes
        iota_bytes = tb * vl * 4                      # cached iota scratch
        work_bytes = 2 * tb * vl * max(itemsize, 2)   # one-hot + matmul staging
    else:
        idx_bytes = 0                                 # indices live in SMEM
        iota_bytes = 0
        work_bytes = tb * ep * 4
    est_vmem = (tbl_bytes + out_bytes + idx_bytes + iota_bytes + work_bytes
                + (4 << 20))

    floating = jnp.issubdtype(dtype, jnp.floating)
    smem_ok = use_onehot or padded <= 65536           # scalar-prefetch ceiling

    if n < 8 or (not floating) or (not smem_ok) or est_vmem > budget:
        # TODO(synk): streamed V-chunk pipeline instead of XLA fallback for
        #             tables that exceed the per-core VMEM budget.
        out = jnp.take(table, flat, axis=0)
        return out.reshape(orig_shape + (e,))

    if padded != n:
        flat = jnp.concatenate(
            [flat, jnp.zeros((padded - n,), dtype=jnp.int32)], axis=0)

    grid = (padded // tb,)
    vmem_limit = int(min(budget, max(est_vmem, 32 << 20)))
    compiler_params = pltpu.CompilerParams(
        # "arbitrary": the one-time table copy / iota init run under
        # program_id==0 and must precede every other step, so the grid stays
        # sequential on one TensorCore.
        dimension_semantics=("arbitrary",),
        vmem_limit_bytes=vmem_limit,
    )
    out_spec = pl.BlockSpec((tb, e), lambda i, *_: (i, 0))
    out_shape = jax.ShapeDtypeStruct((padded, e), dtype)
    tbl_spec = pl.BlockSpec(memory_space=pl.ANY)      # table stays in HBM

    if use_onehot:
        out = pl.pallas_call(
            _onehot_gather_kernel,
            out_shape=out_shape,
            grid_spec=pltpu.PrefetchScalarGridSpec(
                num_scalar_prefetch=0,
                grid=grid,
                in_specs=[
                    pl.BlockSpec((tb, 1), lambda i: (i, 0)),   # token indices
                    tbl_spec,                                   # table (HBM)
                ],
                out_specs=out_spec,
                scratch_shapes=[
                    pltpu.VMEM((v, e), dtype),        # resident table (x1)
                    pltpu.VMEM((tb, v), jnp.int32),   # cached column iota
                    pltpu.SemaphoreType.DMA,          # table-copy semaphore
                ],
            ),
            compiler_params=compiler_params,
        )(flat.reshape(padded, 1), table)
    else:
        out = pl.pallas_call(
            _rowcopy_gather_kernel,
            out_shape=out_shape,
            grid_spec=pltpu.PrefetchScalarGridSpec(
                num_scalar_prefetch=1,                # indices -> SMEM
                grid=grid,
                in_specs=[tbl_spec],                  # table (HBM)
                out_specs=out_spec,
                scratch_shapes=[
                    pltpu.VMEM((v, e), dtype),        # resident table (x1)
                    pltpu.SemaphoreType.DMA,
                ],
            ),
            compiler_params=compiler_params,
        )(flat, table)

    return out[:n].reshape(orig_shape + (e,))


# ---------------------------------------------------------------------------
# Minimal JAX counterpart of the PyTorch module (forward uses the kernel)
# ---------------------------------------------------------------------------

class ExpandableEmbedding:
    def __init__(self, discreteN, initial_dim=4, *, key, dtype=jnp.float32):
        # nn.Embedding default init: N(0, 1).
        self.weight = jax.random.normal(key, (discreteN, initial_dim), dtype)
        self.embedding_dim = initial_dim

    def expand(self, new_dim, *, key):
        """Expand the embedding dim without losing old information."""
        old = self.weight
        discrete_n, old_dim = old.shape
        extra = new_dim - old_dim
        bound = math.sqrt(6.0 / (discrete_n + extra))       # xavier_uniform
        new_cols = jax.random.uniform(
            key, (discrete_n, extra), old.dtype, -bound, bound)
        self.weight = jnp.concatenate([old, new_cols], axis=-1)
        self.embedding_dim = new_dim

    def __call__(self, indices):
        return expandable_embedding_forward(indices, self.weight)


if __name__ == "__main__":
    key = jax.random.PRNGKey(0)
    k_w, k_idx, k_exp, k_idx2 = jax.random.split(key, 4)

    # --- Test 1: module defaults (discreteN=16, initial_dim=4, batch=2, seq=8)
    emb = ExpandableEmbedding(16, 4, key=k_w)
    idx = jax.random.randint(k_idx, (2, 8), 0, 16, dtype=jnp.int32)
    out = jax.block_until_ready(emb(idx))
    ref = emb.weight[idx]
    assert out.shape == (2, 8, 4)
    assert jnp.allclose(out, ref), "Pallas embedding gather mismatch (test 1)"

    # --- Test 2: after expand() to a lane-dense dim; multi-block grid + padding
    emb.expand(128, key=k_exp)
    idx2 = jax.random.randint(k_idx2, (4, 300), 0, 16, dtype=jnp.int32)
    out2 = jax.block_until_ready(emb(idx2))
    ref2 = emb.weight[idx2]
    assert out2.shape == (4, 300, 128)
    assert jnp.allclose(out2, ref2), "Pallas embedding gather mismatch (test 2)"

    print("KERNEL_OK")
</pallas_src>

<mosaic_0001>
module attributes {stable_mosaic.version = 11 : i64} {
  func.func @_onehot_gather_kernel(%arg0: i32, %arg1: memref<16x1xi32, #tpu.memory_space<vmem>>, %arg2: memref<16x4xf32, #tpu.memory_space<any>>, %arg3: memref<16x4xf32, #tpu.memory_space<vmem>>, %arg4: memref<16x4xf32, #tpu.memory_space<vmem>>, %arg5: memref<16x16xi32, #tpu.memory_space<vmem>>, %arg6: memref<!tpu.dma_semaphore, #tpu.memory_space<semaphore_mem>>) attributes {dimension_semantics = [#tpu.dimension_semantics<arbitrary>], iteration_bounds = array<i64: 1>, scalar_prefetch = 0 : i64, scratch_operands = 3 : i64, tpu.core_type = #tpu.core_type<tc>, window_params = [{transform_indices = @transform_0, window_bounds = array<i64: 16, 1>}, {}, {transform_indices = @transform_2, window_bounds = array<i64: 16, 4>}]} {
    %c0_i32 = arith.constant 0 : i32
    %0 = arith.cmpi eq, %arg0, %c0_i32 : i32
    %1 = arith.extui %0 : i1 to i32
    %c0_i32_0 = arith.constant 0 : i32
    %2 = arith.cmpi ne, %1, %c0_i32_0 : i32
    scf.if %2 {
      tpu.enqueue_dma source(%arg2 : memref<16x4xf32, #tpu.memory_space<any>>) target(%arg4 : memref<16x4xf32, #tpu.memory_space<vmem>>) target_semaphore(%arg6 : memref<!tpu.dma_semaphore, #tpu.memory_space<semaphore_mem>>)
      tpu.wait_dma2 semaphore(%arg6 : memref<!tpu.dma_semaphore, #tpu.memory_space<semaphore_mem>>) src(%arg2 : memref<16x4xf32, #tpu.memory_space<any>>) dst(%arg4 : memref<16x4xf32, #tpu.memory_space<vmem>>)
      %12 = tpu.iota {dimensions = array<i32: 1>} : vector<16x16xi32>
      %c0_8 = arith.constant 0 : index
      %c0_9 = arith.constant 0 : index
      %13 = vector.load %arg5[%c0_8, %c0_9] : memref<16x16xi32, #tpu.memory_space<vmem>>, vector<16x16xi32>
      tpu.vector_store %arg5[%c0_8, %c0_9], %12 {strides = array<i32>} : memref<16x16xi32, #tpu.memory_space<vmem>>, vector<16x16xi32>,
    } else {
    }
    %c0 = arith.constant 0 : index
    %c0_1 = arith.constant 0 : index
    %3 = vector.load %arg1[%c0, %c0_1] : memref<16x1xi32, #tpu.memory_space<vmem>>, vector<16x1xi32>
    %c0_2 = arith.constant 0 : index
    %c0_3 = arith.constant 0 : index
    %4 = vector.load %arg5[%c0_2, %c0_3] : memref<16x16xi32, #tpu.memory_space<vmem>>, vector<16x16xi32>
    %5 = vector.broadcast %3 : vector<16x1xi32> to vector<16x16xi32>
    %6 = arith.cmpi eq, %4, %5 : vector<16x16xi32>
    %7 = arith.extui %6 : vector<16x16xi1> to vector<16x16xi32>
    %8 = arith.sitofp %7 : vector<16x16xi32> to vector<16x16xf32>
    %c0_4 = arith.constant 0 : index
    %c0_5 = arith.constant 0 : index
    %9 = vector.load %arg4[%c0_4, %c0_5] : memref<16x4xf32, #tpu.memory_space<vmem>>, vector<16x4xf32>
    %cst = arith.constant dense<0.000000e+00> : vector<16x4xf32>
    %10 = tpu.matmul %8, %9, %cst {dimension_numbers = #tpu.dot_dimension_numbers<[1], [0], [0], [1], [0, 0, 1, 1], [], []>} : vector<16x16xf32>, vector<16x4xf32>, vector<16x4xf32> -> vector<16x4xf32>
    %c0_6 = arith.constant 0 : index
    %c0_7 = arith.constant 0 : index
    %11 = vector.load %arg3[%c0_6, %c0_7] : memref<16x4xf32, #tpu.memory_space<vmem>>, vector<16x4xf32>
    tpu.vector_store %arg3[%c0_6, %c0_7], %10 {strides = array<i32>} : memref<16x4xf32, #tpu.memory_space<vmem>>, vector<16x4xf32>,
    return
  }
  func.func @transform_0(%arg0: i32) -> (i32, i32) {
    %c0_i32 = arith.constant 0 : i32
    %c0_i32_0 = arith.constant 0 : i32
    return %arg0, %c0_i32 : i32, i32
  }
  func.func @transform_2(%arg0: i32) -> (i32, i32) {
    %c0_i32 = arith.constant 0 : i32
    %c0_i32_0 = arith.constant 0 : i32
    return %arg0, %c0_i32 : i32, i32
  }
}

</mosaic_0001>

<bundles_post_ra>
// kernel: tpu_custom_call.1
= control target key start
LH: loop header
LB: loop body
LE: loop exit
PB: predicated region body
PF: predicated region fallthrough
CT: control target
= control target key end

     0   :  { %s250_s0 = inlined_call_operand.vmem [shape: s32[16,1], index: 0, kind: input, shape index: {}]   ;;  %s251_s1 = inlined_call_operand.vmem [shape: f32[16,4], index: 1, kind: input, shape index: {}]   ;;  %s252_s2 = inlined_call_operand.vmem [shape: f32[16,4], index: 2, kind: output, shape index: {}]  }
   0x1   :  { %v45_v0 = vld [vmem:[%s251_s1] sm:$0xff]  ;;  %v47_v1 = vld [vmem:[%s251_s1 + $0x8] sm:$0xff] }
   0x2   :  { %56 = vsyncadd [#allocation4], 256 }
   0x3   :  { %209 = dma.done.wait [#allocation4], 256 }
   0x4   :  { %210 = vsyncadd [#allocation4], 4294967040  ;;  %v60_v2 = vlaneseq  ;;  %v211_v3 = vmov 0   ;;  %vm62_vm0 = vcmask 130048   ;;  %v65_v5 = vld [vmem:[%s250_s0] sm:$0xff]  ;;  %v202_v6 = vpack.c.bf16 %v47_v1, %v45_v0  ;;  %v66_v7 = vld [vmem:[%s250_s0 + $0x8] sm:$0xff] }
   0x5   :  { %208 = vset.pattern.permute.xlu0 %v211_v3  ;;  %v212_v10 = vmov 0.0   ;;  %vm165_vm3 = vcmask 31744  }
   0x6   :  { %v61_v4 = vand.u32 127, %v60_v2  ;;  %70 = vperm.xlu0 %208, %v65_v5   ;;  %203 = vmatprep.subr.bf16.mxu0 %v202_v6 }
   0x7   :  { %205 = vmatpush3.bf16.msra.mxu0 %v202_v6 }
   0x8   :  { %63 = vst.msk [vmem:[#allocation3] sm:$0xff] %vm62_vm0, %v61_v4  ;;  %64 = vst.msk [vmem:[#allocation3 + $0x8] sm:$0xff] %vm62_vm0, %v61_v4 }
   0xa   :  { %73 = vperm.xlu0 %208, %v66_v7  }
   0xf   :  { %v67_v8 = vld [vmem:[#allocation3] sm:$0xff]  ;;  %v68_v12 = vld [vmem:[#allocation3 + $0x8] sm:$0xff] }
  0x85   :  { %v71_v9 = vpop.permute.xlu0 %70 }
  0x86   :  { %vm75_vm1 = vcmp.eq.s32.totalorder %v67_v8, %v71_v9 }
  0x87   :  { %v186_v11 = vsel %vm75_vm1, 1.0, %v212_v10 }
  0x88   :  { %199 = vmatprep.mubr.msk.f32.mxu0 %vm62_vm0, %v186_v11 }
  0x89   :  { %v74_v13 = vpop.permute.xlu0 %73 }
  0x8a   :  { %vm76_vm2 = vcmp.eq.s32.totalorder %v68_v12, %v74_v13 }
  0x8b   :  { %v187_v14 = vsel %vm76_vm2, 1.0, %v212_v10 }
  0x8c   :  { %200 = vmatmul.mubr.msk.f32.vlgmr.msra.gmra.mrb[0].mxu0 %vm62_vm0, %v187_v14 }
 0x15f   :  { %v201_v15 = vpop.f32.mrb[0].mxu0 }
 0x160   :  { %167 = vst.msk [vmem:[%s252_s2 + $0x8] sm:$0xff] %vm165_vm3, %v201_v15  ;;  %v156_v16 = vpop.f32.mrb[1].mxu0 }
 0x161   :  { %166 = vst.msk [vmem:[%s252_s2] sm:$0xff] %vm165_vm3, %v156_v16 }
 0x162   :  { %172 = vsyncmov [#allocation4] }
 0x165   :  { %s173_s19 = vpop.sfrf %172 }
 0x166   :  { %p190_p0 = scmp.ne.s32.totalorder %s173_s19, 0 }
 0x168   :  { %177 = shalt.err (%p190_p0)  }

</bundles_post_ra>
